<compile_context>
chip_gen: v6e
topology: v6e:2x2x1
jax: 0.10.0
libtpu: 0.0.40
codegen_flags: <defaults>
</compile_context>

<pallas_src>
import jax
import jax.numpy as jnp
from jax.experimental import pallas as pl
from jax.experimental.pallas import tpu as pltpu


def _round_up(a, m):
    return (a + m - 1) // m * m


def _pick_tile(total, target, quantum):
    """Largest multiple of `quantum` that divides `total` and is <= target."""
    t = min(target, total)
    t = max((t // quantum) * quantum, quantum)
    while total % t:
        t -= quantum
    return t


def residual_linear_kernel(x_ref, w_ref, b_ref, r_ref, o_ref, acc_ref):
    """One (TM, TN) output tile; accumulates over the K grid axis.

    x_ref: (TM, TK) f32   -- matmul LHS tile (cast to bf16 for the MXU)
    w_ref: (TK, TN) bf16  -- weight tile
    b_ref: (1,  TN) f32   -- bias slab
    r_ref: (TM, TN) f32   -- residual tile of x
    o_ref: (TM, TN)       -- output tile
    acc_ref: (TM, TN) f32 -- VMEM accumulator (persists across K steps)
    """
    k = pl.program_id(2)

    @pl.when(k == 0)
    def _init():
        acc_ref[...] = jnp.zeros_like(acc_ref)

    acc_ref[...] += jnp.dot(
        x_ref[...].astype(jnp.bfloat16),
        w_ref[...],
        preferred_element_type=jnp.float32,
    )

    @pl.when(k == pl.num_programs(2) - 1)
    def _finalize():
        y = acc_ref[...] + b_ref[...] + r_ref[...].astype(jnp.float32)
        o_ref[...] = y.astype(o_ref.dtype)


def residual_linear(x, w, b, *, tm=256, tn=512, tk=512):
    """x: (B, S, H); w: (H, H); b: (H,). Returns fn(x) + x with fn = Linear."""
    B, S, H = x.shape
    M = B * S

    # --- tile / padding choices -------------------------------------------
    HP = _round_up(H, 128)                     # lane-dense last dim
    TM = max((min(tm, _round_up(M, 8)) // 8) * 8, 8)
    MP = _round_up(M, TM)
    TN = _pick_tile(HP, tn, 128)
    TK = _pick_tile(HP, tk, 128)

    # --- pad operands to the tiled shapes ---------------------------------
    x2d = x.reshape(M, H)
    x_pad = jnp.pad(x2d, ((0, MP - M), (0, HP - H))) if (MP != M or HP != H) else x2d
    w_pad = jnp.pad(w, ((0, HP - H), (0, HP - H))) if HP != H else w
    w_bf16 = w_pad.astype(jnp.bfloat16)        # bf16 weights for the MXU / half DMA
    b_pad = (jnp.pad(b, (0, HP - H)) if HP != H else b).reshape(1, HP)

    grid = (MP // TM, HP // TN, HP // TK)

    # --- VMEM budget (double-buffered ins/outs + accumulator) -------------
    vmem_bytes = (
        2 * (TM * TK * 4 + TK * TN * 2 + TN * 4 + TM * TN * 4 + TM * TN * 4)
        + TM * TN * 4
        + (4 << 20)  # headroom
    )
    vmem_limit = min(max(vmem_bytes, 32 << 20), 64 << 20)

    out = pl.pallas_call(
        residual_linear_kernel,
        out_shape=jax.ShapeDtypeStruct((MP, HP), x.dtype),
        grid_spec=pltpu.PrefetchScalarGridSpec(
            num_scalar_prefetch=0,
            grid=grid,
            in_specs=[
                pl.BlockSpec((TM, TK), lambda i, j, k: (i, k)),   # x (matmul LHS)
                pl.BlockSpec((TK, TN), lambda i, j, k: (k, j)),   # W (bf16)
                pl.BlockSpec((1, TN), lambda i, j, k: (0, j)),    # bias
                pl.BlockSpec((TM, TN), lambda i, j, k: (i, j)),   # x (residual)
            ],
            out_specs=pl.BlockSpec((TM, TN), lambda i, j, k: (i, j)),
            scratch_shapes=[pltpu.VMEM((TM, TN), jnp.float32)],
        ),
        compiler_params=pltpu.CompilerParams(
            dimension_semantics=("parallel", "parallel", "arbitrary"),
            vmem_limit_bytes=vmem_limit,
        ),
    )(x_pad, w_bf16, b_pad, x_pad)

    return out[:M, :H].reshape(B, S, H)


if __name__ == "__main__":
    key = jax.random.PRNGKey(0)
    k_x, k_w, k_b = jax.random.split(key, 3)

    batch, seq, hidden = 2, 8, 32
    x = jax.random.normal(k_x, (batch, seq, hidden), dtype=jnp.float32)
    # Deterministic parameter init (synthetic; mimics nn.Linear(hidden, hidden)).
    w = jax.random.normal(k_w, (hidden, hidden), dtype=jnp.float32) * (1.0 / hidden ** 0.5)
    b = jax.random.normal(k_b, (hidden,), dtype=jnp.float32) * 0.01

    out = residual_linear(x, w, b)
    out = jax.block_until_ready(out)

    # References: bf16-matmul reference (matches kernel's MXU path) and a loose
    # f32 reference (sanity on structure: matmul + bias + residual).
    x2d = x.reshape(batch * seq, hidden)
    ref_bf16 = (
        jnp.dot(x2d.astype(jnp.bfloat16), w.astype(jnp.bfloat16),
                preferred_element_type=jnp.float32)
        + b + x2d
    ).reshape(batch, seq, hidden)
    ref_f32 = (x2d @ w + b + x2d).reshape(batch, seq, hidden)

    assert out.shape == x.shape and out.dtype == x.dtype
    assert jnp.allclose(out, ref_bf16, atol=1e-2, rtol=1e-2)
    assert jnp.allclose(out, ref_f32, atol=5e-2, rtol=5e-2)

    print("KERNEL_OK")
</pallas_src>

<mosaic_0001>
module attributes {stable_mosaic.version = 11 : i64} {
  func.func @residual_linear_kernel(%arg0: i32, %arg1: i32, %arg2: i32, %arg3: memref<16x128xf32, #tpu.memory_space<vmem>>, %arg4: memref<128x128xbf16, #tpu.memory_space<vmem>>, %arg5: memref<1x128xf32, #tpu.memory_space<vmem>>, %arg6: memref<16x128xf32, #tpu.memory_space<vmem>>, %arg7: memref<16x128xf32, #tpu.memory_space<vmem>>, %arg8: memref<16x128xf32, #tpu.memory_space<vmem>>) attributes {dimension_semantics = [#tpu.dimension_semantics<parallel>, #tpu.dimension_semantics<parallel>, #tpu.dimension_semantics<arbitrary>], iteration_bounds = array<i64: 1, 1, 1>, scalar_prefetch = 0 : i64, scratch_operands = 1 : i64, tpu.core_type = #tpu.core_type<tc>, window_params = [{transform_indices = @transform_0, window_bounds = array<i64: 16, 128>}, {transform_indices = @transform_1, window_bounds = array<i64: 128, 128>}, {transform_indices = @transform_2, window_bounds = array<i64: 1, 128>}, {transform_indices = @transform_3, window_bounds = array<i64: 16, 128>}, {transform_indices = @transform_4, window_bounds = array<i64: 16, 128>}]} {
    %c0_i32 = arith.constant 0 : i32
    %0 = arith.cmpi eq, %arg2, %c0_i32 : i32
    %1 = arith.extui %0 : i1 to i32
    %c0_i32_0 = arith.constant 0 : i32
    %2 = arith.cmpi ne, %1, %c0_i32_0 : i32
    scf.if %2 {
      %cst_10 = arith.constant 0.000000e+00 : f32
      %13 = vector.broadcast %cst_10 : f32 to vector<16x128xf32>
      %c0_11 = arith.constant 0 : index
      %c0_12 = arith.constant 0 : index
      %14 = vector.load %arg8[%c0_11, %c0_12] : memref<16x128xf32, #tpu.memory_space<vmem>>, vector<16x128xf32>
      tpu.vector_store %arg8[%c0_11, %c0_12], %13 {strides = array<i32>} : memref<16x128xf32, #tpu.memory_space<vmem>>, vector<16x128xf32>,
    } else {
    }
    %c0 = arith.constant 0 : index
    %c0_1 = arith.constant 0 : index
    %3 = vector.load %arg8[%c0, %c0_1] : memref<16x128xf32, #tpu.memory_space<vmem>>, vector<16x128xf32>
    %c0_2 = arith.constant 0 : index
    %c0_3 = arith.constant 0 : index
    %4 = vector.load %arg3[%c0_2, %c0_3] : memref<16x128xf32, #tpu.memory_space<vmem>>, vector<16x128xf32>
    %5 = arith.truncf %4 : vector<16x128xf32> to vector<16x128xbf16>
    %c0_4 = arith.constant 0 : index
    %c0_5 = arith.constant 0 : index
    %6 = vector.load %arg4[%c0_4, %c0_5] : memref<128x128xbf16, #tpu.memory_space<vmem>>, vector<128x128xbf16>
    %cst = arith.constant dense<0.000000e+00> : vector<16x128xf32>
    %7 = tpu.matmul %5, %6, %cst {dimension_numbers = #tpu.dot_dimension_numbers<[1], [0], [0], [1], [0, 0, 1, 1], [], []>} : vector<16x128xbf16>, vector<128x128xbf16>, vector<16x128xf32> -> vector<16x128xf32>
    %8 = arith.addf %3, %7 : vector<16x128xf32>
    %c0_6 = arith.constant 0 : index
    %c0_7 = arith.constant 0 : index
    %9 = vector.load %arg8[%c0_6, %c0_7] : memref<16x128xf32, #tpu.memory_space<vmem>>, vector<16x128xf32>
    tpu.vector_store %arg8[%c0_6, %c0_7], %8 {strides = array<i32>} : memref<16x128xf32, #tpu.memory_space<vmem>>, vector<16x128xf32>,
    %c0_i32_8 = arith.constant 0 : i32
    %10 = arith.cmpi eq, %arg2, %c0_i32_8 : i32
    %11 = arith.extui %10 : i1 to i32
    %c0_i32_9 = arith.constant 0 : i32
    %12 = arith.cmpi ne, %11, %c0_i32_9 : i32
    scf.if %12 {
      %c0_10 = arith.constant 0 : index
      %c0_11 = arith.constant 0 : index
      %13 = vector.load %arg8[%c0_10, %c0_11] : memref<16x128xf32, #tpu.memory_space<vmem>>, vector<16x128xf32>
      %c0_12 = arith.constant 0 : index
      %c0_13 = arith.constant 0 : index
      %14 = vector.load %arg5[%c0_12, %c0_13] : memref<1x128xf32, #tpu.memory_space<vmem>>, vector<1x128xf32>
      %15 = vector.broadcast %14 : vector<1x128xf32> to vector<16x128xf32>
      %16 = arith.addf %13, %15 : vector<16x128xf32>
      %c0_14 = arith.constant 0 : index
      %c0_15 = arith.constant 0 : index
      %17 = vector.load %arg6[%c0_14, %c0_15] : memref<16x128xf32, #tpu.memory_space<vmem>>, vector<16x128xf32>
      %18 = arith.addf %16, %17 : vector<16x128xf32>
      %c0_16 = arith.constant 0 : index
      %c0_17 = arith.constant 0 : index
      %19 = vector.load %arg7[%c0_16, %c0_17] : memref<16x128xf32, #tpu.memory_space<vmem>>, vector<16x128xf32>
      tpu.vector_store %arg7[%c0_16, %c0_17], %18 {strides = array<i32>} : memref<16x128xf32, #tpu.memory_space<vmem>>, vector<16x128xf32>,
    } else {
    }
    return
  }
  func.func @transform_0(%arg0: i32, %arg1: i32, %arg2: i32) -> (i32, i32) {
    %c0_i32 = arith.constant 0 : i32
    return %arg0, %arg2 : i32, i32
  }
  func.func @transform_1(%arg0: i32, %arg1: i32, %arg2: i32) -> (i32, i32) {
    %c0_i32 = arith.constant 0 : i32
    return %arg2, %arg1 : i32, i32
  }
  func.func @transform_2(%arg0: i32, %arg1: i32, %arg2: i32) -> (i32, i32) {
    %c0_i32 = arith.constant 0 : i32
    %c0_i32_0 = arith.constant 0 : i32
    return %c0_i32, %arg1 : i32, i32
  }
  func.func @transform_3(%arg0: i32, %arg1: i32, %arg2: i32) -> (i32, i32) {
    %c0_i32 = arith.constant 0 : i32
    return %arg0, %arg1 : i32, i32
  }
  func.func @transform_4(%arg0: i32, %arg1: i32, %arg2: i32) -> (i32, i32) {
    %c0_i32 = arith.constant 0 : i32
    return %arg0, %arg1 : i32, i32
  }
}

</mosaic_0001>

<bundles_post_ra>
// kernel: tpu_custom_call.1
= control target key start
LH: loop header
LB: loop body
LE: loop exit
PB: predicated region body
PF: predicated region fallthrough
CT: control target
= control target key end

     0   :  { %9 = vsyncpa [#allocation4], 0  ;;  %s419_s0 = inlined_call_operand.hbm [shape: f32[16,128], index: 0, kind: input, shape index: {}]   ;;  %s420_s1 = inlined_call_operand.hbm [shape: bf16[128,128], index: 1, kind: input, shape index: {}]   ;;  %s421_s2 = inlined_call_operand.vmem [shape: f32[1,128], index: 2, kind: input, shape index: {}]   ;;  %s422_s3 = inlined_call_operand.hbm [shape: f32[16,128], index: 3, kind: input, shape index: {}]   ;;  %s423_s4 = inlined_call_operand.hbm [shape: f32[16,128], index: 4, kind: output, shape index: {}]  }
   0x1   :  { %10 = vsyncpa [#allocation7], 0 }
   0x2   :  { %11 = vsyncpa [#allocation5], 0  ;;  %s360_s15 = smov [#allocation6]  }
   0x3   :  { %s29_s16 = sshll.u32 %s360_s15, 4  ;;  %s30_s16 = int_to_ptr.vmem [resolvable:$true] %s29_s16 }
   0x4   :  { %s282_s17 = scalar_lea.vmem %s30_s16, 1024  ;;  %p287_p1 = scmp.lt.s32.totalorder %s30_s16, %s30_s16 }
   0x5   :  { %p283_p0 = scmp.ne.s32.totalorder %s30_s16, %s282_s17  ;;  %p288_p2 = scmp.lt.s32.totalorder %s282_s17, %s282_s17 }
   0x7   :  { %p289_p3 = por %p288_p2, %p287_p1 }
   0x9   :  { %p290_p4 = pnand %p289_p3, %p283_p0 }
   0xb   :  { %293 = shalt.err (!%p290_p4)
}
   0xc   :  { %s361_s18 = smov 64   ;;  %s362_s19 = smov 4  }
   0xd   :  { %35 = dma.hbm_to_vmem [thread:$0]  %s420_s1, 1024, %s30_s16, [#allocation7], %s361_s18, %s361_s18, %s362_s19  }
   0xe   :  { %s363_s22 = smov [#allocation3]  }
   0xf   :  { %s17_s23 = sshll.u32 %s363_s22, 4  ;;  %s18_s23 = int_to_ptr.vmem [resolvable:$true] %s17_s23 }
  0x10   :  { %s302_s24 = scalar_lea.vmem %s18_s23, 256  ;;  %p307_p6 = scmp.lt.s32.totalorder %s18_s23, %s18_s23 }
  0x11   :  { %p303_p5 = scmp.ne.s32.totalorder %s18_s23, %s302_s24  ;;  %p308_p7 = scmp.lt.s32.totalorder %s302_s24, %s302_s24 }
  0x13   :  { %p309_p8 = por %p308_p7, %p307_p6 }
  0x15   :  { %p310_p9 = pnand %p309_p8, %p303_p5 }
  0x17   :  { %313 = shalt.err (!%p310_p9)
}
  0x18   :  { %s364_s25 = smov 128   ;;  %s365_s26 = smov 8  }
  0x19   :  { %23 = dma.hbm_to_vmem [thread:$0]  %s419_s0, 256, %s18_s23, [#allocation4], %s364_s25, %s364_s25, %s365_s26  }
  0x1a   :  { %s366_s1 = smov [#allocation8]  }
  0x1b   :  { %s43_s29 = sshll.u32 %s366_s1, 4  ;;  %s44_s29 = int_to_ptr.vmem [resolvable:$true] %s43_s29 }
  0x1c   :  { %s322_s30 = scalar_lea.vmem %s44_s29, 256  ;;  %p327_p11 = scmp.lt.s32.totalorder %s44_s29, %s44_s29 }
  0x1d   :  { %p323_p10 = scmp.ne.s32.totalorder %s44_s29, %s322_s30  ;;  %p328_p12 = scmp.lt.s32.totalorder %s322_s30, %s322_s30 }
  0x1f   :  { %p329_p13 = por %p328_p12, %p327_p11 }
  0x21   :  { %p330_p0 = pnand %p329_p13, %p323_p10 }
  0x23   :  { %333 = shalt.err (!%p330_p0)
}
  0x24   :  { %49 = dma.hbm_to_vmem [thread:$0]  %s422_s3, 256, %s44_s29, [#allocation7], %s364_s25, %s364_s25, %s365_s26  }
  0x25   :  { %354 = dma.done.wait [#allocation4], 256  }
  0x26   :  { %355 = vsyncadd [#allocation4], 4294967040 }
  0x27   :  { %356 = dma.done.wait [#allocation7], 1280  }
  0x28   :  { %357 = vsyncadd [#allocation7], 4294966016  ;;  %v367_v0 = vmov 0.0   ;;  %vm368_vm0 = vmmov 0   ;;  %v266_v1 = vld [vmem:[#allocation6 + $0x38] sm:$0xff]   ;;  %v267_v2 = vld [vmem:[#allocation6 + $0x30] sm:$0xff]  }
  0x29   :  { %236 = vmatprep.subr.bf16.mxu0 %v367_v0  ;;  %252 = vmatprep.mubr.msk.bf16.mxu0 %vm368_vm0, %v367_v0  ;;  %v268_v3 = vld [vmem:[#allocation6 + $0x28] sm:$0xff]   ;;  %v269_v4 = vld [vmem:[#allocation6 + $0x20] sm:$0xff]   ;;  %v270_v5 = vld [vmem:[#allocation6 + $0x18] sm:$0xff]   ;;  %s369_s7 = smov [#allocation9]  }
  0x2a   :  { %237 = vmatpush3.bf16.msra.mxu0 %v266_v1  ;;  %v271_v6 = vld [vmem:[#allocation6 + $0x10] sm:$0xff]   ;;  %v272_v7 = vld [vmem:[#allocation6 + $0x8] sm:$0xff]   ;;  %v273_v8 = vld [vmem:[#allocation6] sm:$0xff]   ;;  %s205_s8 = sshll.u32 %s369_s7, 4  ;;  %s206_s8 = int_to_ptr.vmem [resolvable:$true] %s205_s8 }
  0x2b   :  { %238 = vmatprep.subr.bf16.mxu0 %v367_v0  ;;  %v68_v9 = vld [vmem:[#allocation3] sm:$0xff]  ;;  %v69_v10 = vld [vmem:[#allocation3 + $0x8] sm:$0xff]  ;;  %v194_v14 = vld [vmem:[#allocation8] sm:$0xff]  ;;  %s334_s9 = scalar_lea.vmem %s206_s8, 256  ;;  %p339_p2 = scmp.lt.s32.totalorder %s206_s8, %s206_s8 }
  0x2c   :  { %v70_v11 = vpack.c.bf16 %v69_v10, %v68_v9  ;;  %v226_v12 = vld [vmem:[%s421_s2] ss:$0 sm:$0xff]  ;;  %v195_v19 = vld [vmem:[#allocation8 + $0x8] sm:$0xff]  ;;  %p335_p1 = scmp.ne.s32.totalorder %s206_s8, %s334_s9  ;;  %p340_p3 = scmp.lt.s32.totalorder %s334_s9, %s334_s9 }
  0x2e   :  { %239 = vmatpush3.bf16.msra.mxu0 %v267_v2  ;;  %p341_p4 = por %p340_p3, %p339_p2 }
  0x2f   :  { %240 = vmatprep.subr.bf16.mxu0 %v367_v0 }
  0x30   :  { %p342_p5 = pnand %p341_p4, %p335_p1 }
  0x32   :  { %241 = vmatpush3.bf16.msra.mxu0 %v268_v3 }
  0x33   :  { %242 = vmatprep.subr.bf16.mxu0 %v367_v0 }
  0x36   :  { %243 = vmatpush3.bf16.msra.mxu0 %v269_v4 }
  0x37   :  { %244 = vmatprep.subr.bf16.mxu0 %v367_v0 }
  0x3a   :  { %245 = vmatpush3.bf16.msra.mxu0 %v270_v5 }
  0x3b   :  { %246 = vmatprep.subr.bf16.mxu0 %v367_v0 }
  0x3e   :  { %247 = vmatpush3.bf16.msra.mxu0 %v271_v6 }
  0x3f   :  { %248 = vmatprep.subr.bf16.mxu0 %v367_v0 }
  0x42   :  { %249 = vmatpush3.bf16.msra.mxu0 %v272_v7 }
  0x43   :  { %250 = vmatprep.subr.bf16.mxu0 %v367_v0 }
  0x46   :  { %251 = vmatpush3.bf16.msra.mxu0 %v273_v8 }
  0x49   :  { %253 = vmatmul.mubr.bf16.vlgmr.msra.gmra.mxu0 %v70_v11 }
 0x109   :  { %v169_v13 = vpop.f32.mrf.mxu0 }
 0x10a   :  { %v192_v15 = vadd.f32 %v226_v12, %v169_v13 }
 0x10b   :  { %v254_v16 = vpop.f32.mrf.mxu0 }
 0x10c   :  { %v196_v17 = vadd.f32 %v194_v14, %v192_v15 }
 0x10d   :  { %v172_v18 = vpop.f32.mrf.mxu0 }
 0x10e   :  { %198 = vst [vmem:[#allocation9] sm:$0xff] %v196_v17  ;;  %v193_v20 = vadd.f32 %v226_v12, %v172_v18 }
 0x10f   :  { %v255_v21 = vpop.f32.mrf.mxu0 }
 0x110   :  { %v197_v22 = vadd.f32 %v195_v19, %v193_v20 }
 0x112   :  { %199 = vst [vmem:[#allocation9 + $0x8] sm:$0xff] %v197_v22 }
 0x113   :  { %345 = shalt.err (!%p342_p5)
}
 0x114   :  { %211 = dma.vmem_to_hbm [thread:$0]  %s206_s8, 256, %s423_s4, [#allocation5], %s364_s25, %s364_s25, %s365_s26  }
 0x115   :  { %358 = dma.done.wait [#allocation5], 256  }
 0x116   :  { %359 = vsyncadd [#allocation5], 4294967040 }
 0x117   :  { %215 = vsyncpa [#allocation4], 1 }
 0x118   :  { %216 = vsyncpa [#allocation7], 1 }
 0x119   :  { %217 = vsyncpa [#allocation5], 1 }

</bundles_post_ra>
